<compile_context>
chip_gen: v6e
topology: v6e:2x2x1
jax: 0.10.0
libtpu: 0.0.40
codegen_flags: <defaults>
</compile_context>

<pallas_src>
import jax
import jax.numpy as jnp
import numpy as np
from jax.experimental import pallas as pl
from jax.experimental.pallas import tpu as pltpu  # noqa: F401  (TPU backend)

KH, KW = 4, 4          # conv kernel size
C_HALF = 3             # channels of each of x1 / x2
C_IN = 2 * C_HALF      # 6 after channel concat
C_OUT = 3
BN_EPS = 1e-5


# --------------------------------------------------------------------------
# Kernel: single invocation, whole batch, one GEMM per input half.
# --------------------------------------------------------------------------
def fused_cat_conv_bn_kernel(x1_ref, x2_ref, w_ref, b_ref, o_ref):
    """out = x1_flat @ W1 + x2_flat @ W2 + bias   (concat/conv/BN all folded).

    x1_ref, x2_ref : (N, C_HALF*H*W)              f32, flattened NCHW inputs
    w_ref          : (4, C_HALF*H*W, C_OUT*Ho*Wo) bf16 = [W1_hi, W1_lo, W2_hi, W2_lo]
    b_ref          : (1, C_OUT*Ho*Wo)             f32, fused conv bias + BN shift
    o_ref          : (N, C_OUT*Ho*Wo)             f32, lane-dense flattened output
    """

    def split_bf16(x):
        hi = x.astype(jnp.bfloat16)
        lo = (x - hi.astype(jnp.float32)).astype(jnp.bfloat16)
        return hi, lo

    def exact_dot(x, w_hi, w_lo):
        # bf16 hi/lo decomposition: 4 tiny MXU matmuls, f32 accumulation,
        # ~full f32 accuracy without relying on f32-matmul precision modes.
        x_hi, x_lo = split_bf16(x)
        acc = jnp.dot(x_hi, w_hi, preferred_element_type=jnp.float32)
        acc = acc + jnp.dot(x_lo, w_hi, preferred_element_type=jnp.float32)
        acc = acc + jnp.dot(x_hi, w_lo, preferred_element_type=jnp.float32)
        acc = acc + jnp.dot(x_lo, w_lo, preferred_element_type=jnp.float32)
        return acc

    acc = exact_dot(x1_ref[...], w_ref[0], w_ref[1])
    acc = acc + exact_dot(x2_ref[...], w_ref[2], w_ref[3])
    o_ref[...] = acc + b_ref[...]


# --------------------------------------------------------------------------
# One-time parameter preprocessing (hoisted out of the per-call path).
# --------------------------------------------------------------------------
def prepare_params(params, spatial_hw):
    """Fold inference-mode BatchNorm into the conv weights and unroll the conv
    (including the channel concat) into dense Toeplitz matrices so the kernel
    is a single GEMM with zero in-kernel data rearrangement."""
    w, b, gamma, beta, run_mean, run_var = params
    H, W = spatial_hw
    Ho, Wo = H - KH + 1, W - KW + 1

    # Exact BN fold:  y = scale*(conv(x)+b-mean)+beta,  scale = gamma/sqrt(var+eps)
    scale = gamma / jnp.sqrt(run_var + BN_EPS)                        # (C_OUT,)
    w_folded = (w * scale[:, None, None, None]).astype(jnp.float32)   # (C_OUT, C_IN, KH, KW)
    bias_c = ((b - run_mean) * scale + beta).astype(jnp.float32)      # (C_OUT,)

    # Static (numpy) index plumbing for the Toeplitz expansion.
    k = np.arange(C_HALF * H * W)
    c_in = k // (H * W)
    h = (k // W) % H
    wc = k % W
    o = np.arange(C_OUT * Ho * Wo)
    co = o // (Ho * Wo)
    oh = (o // Wo) % Ho
    ow = o % Wo
    ki = h[:, None] - oh[None, :]                     # kernel row tap, (K, O)
    kj = wc[:, None] - ow[None, :]                    # kernel col tap, (K, O)
    valid = (ki >= 0) & (ki < KH) & (kj >= 0) & (kj < KW)
    ki_c = np.clip(ki, 0, KH - 1)
    kj_c = np.clip(kj, 0, KW - 1)

    w_flat = w_folded.reshape(-1)
    valid_j = jnp.asarray(valid)

    def toeplitz(half):
        cc = c_in[:, None] + half * C_HALF            # channel index inside concat
        idx = ((co[None, :] * C_IN + cc) * KH + ki_c) * KW + kj_c
        idx = jnp.asarray(idx, dtype=jnp.int32)
        return jnp.where(valid_j, w_flat[idx], 0.0)   # (C_HALF*H*W, C_OUT*Ho*Wo)

    def split_bf16(a):
        hi = a.astype(jnp.bfloat16)
        lo = (a - hi.astype(jnp.float32)).astype(jnp.bfloat16)
        return hi, lo

    w1_hi, w1_lo = split_bf16(toeplitz(0))
    w2_hi, w2_lo = split_bf16(toeplitz(1))
    w_all = jnp.stack([w1_hi, w1_lo, w2_hi, w2_lo], axis=0)   # (4, K, O) bf16
    bias_row = jnp.repeat(bias_c, Ho * Wo)[None, :]           # (1, C_OUT*Ho*Wo) f32
    return w_all, bias_row


# --------------------------------------------------------------------------
# Per-call forward: two free reshapes + one pallas_call + one free reshape.
# --------------------------------------------------------------------------
def model_forward(x1_nchw, x2_nchw, prepared):
    """x1, x2: (N, 3, H, W) float32. Returns (N, 3, Ho, Wo) float32 (NCHW).
    `prepared` must come from prepare_params(params, (H, W))."""
    w_all, bias_row = prepared
    N, _, H, W = x1_nchw.shape
    Ho, Wo = H - KH + 1, W - KW + 1

    x1f = x1_nchw.reshape(N, C_HALF * H * W)     # row-major flatten: free
    x2f = x2_nchw.reshape(N, C_HALF * H * W)

    # No grid / no BlockSpecs: single invocation, each tiny operand is one
    # whole-array DMA into VMEM, and the output is one lane-dense slab.
    out_flat = pl.pallas_call(
        fused_cat_conv_bn_kernel,
        out_shape=jax.ShapeDtypeStruct((N, C_OUT * Ho * Wo), jnp.float32),
    )(x1f, x2f, w_all, bias_row)

    return out_flat.reshape(N, C_OUT, Ho, Wo)


# --------------------------------------------------------------------------
# Parameters / reference
# --------------------------------------------------------------------------
def init_params(key):
    k_w, k_b, k_g, k_be, k_m, k_v = jax.random.split(key, 6)
    fan_in = C_IN * KH * KW
    bound = 1.0 / np.sqrt(fan_in)
    w = jax.random.uniform(k_w, (C_OUT, C_IN, KH, KW), jnp.float32, -bound, bound)
    b = jax.random.uniform(k_b, (C_OUT,), jnp.float32, -bound, bound)
    gamma = jax.random.uniform(k_g, (C_OUT,), jnp.float32, 0.5, 1.5)
    beta = jax.random.uniform(k_be, (C_OUT,), jnp.float32, -0.5, 0.5)
    run_mean = jax.random.uniform(k_m, (C_OUT,), jnp.float32, -0.1, 0.1)
    run_var = jax.random.uniform(k_v, (C_OUT,), jnp.float32, 0.5, 1.5)
    return (w, b, gamma, beta, run_mean, run_var)


def reference_forward(x1, x2, params):
    """Plain-JAX reference (same inference semantics, HIGHEST precision)."""
    w, b, gamma, beta, run_mean, run_var = params
    s = jnp.concatenate([x1, x2], axis=1)
    out = jax.lax.conv_general_dilated(
        s, w, window_strides=(1, 1), padding="VALID",
        dimension_numbers=("NCHW", "OIHW", "NCHW"),
        precision=jax.lax.Precision.HIGHEST)
    out = out + b[None, :, None, None]
    scale = gamma / jnp.sqrt(run_var + BN_EPS)
    shift = beta - run_mean * scale
    return out * scale[None, :, None, None] + shift[None, :, None, None]


if __name__ == "__main__":
    key = jax.random.PRNGKey(0)
    k_p, k_x1, k_x2 = jax.random.split(key, 3)

    params = init_params(k_p)
    # small shapes consistent with the module: batch=2, 3 channels, 6x6 spatial
    x1 = jax.random.uniform(k_x1, (2, 3, 6, 6), jnp.float32)
    x2 = jax.random.uniform(k_x2, (2, 3, 6, 6), jnp.float32)

    # One-time preprocessing (BN fold + Toeplitz weights), outside the hot path.
    prepared = prepare_params(params, spatial_hw=(6, 6))
    prepared = jax.block_until_ready(prepared)

    fwd = jax.jit(model_forward)
    out = fwd(x1, x2, prepared)
    jax.block_until_ready(out)

    ref = reference_forward(x1, x2, params)
    assert out.shape == (2, C_OUT, 3, 3), out.shape
    max_err = float(jnp.max(jnp.abs(out - ref)))
    assert jnp.allclose(out, ref, atol=1e-4, rtol=1e-4), max_err
    print("KERNEL_OK")
</pallas_src>

<mosaic_0001>
module attributes {stable_mosaic.version = 11 : i64} {
  func.func @fused_cat_conv_bn_kernel(%arg0: memref<2x108xf32, #tpu.memory_space<vmem>>, %arg1: memref<2x108xf32, #tpu.memory_space<vmem>>, %arg2: memref<4x108x27xbf16, #tpu.memory_space<vmem>>, %arg3: memref<1x27xf32, #tpu.memory_space<vmem>>, %arg4: memref<2x27xf32, #tpu.memory_space<vmem>>) attributes {dimension_semantics = [], scalar_prefetch = 0 : i64, scratch_operands = 0 : i64, tpu.core_type = #tpu.core_type<tc>} {
    %c0 = arith.constant 0 : index
    %c0_0 = arith.constant 0 : index
    %0 = vector.load %arg0[%c0, %c0_0] : memref<2x108xf32, #tpu.memory_space<vmem>>, vector<2x108xf32>
    %c0_1 = arith.constant 0 : index
    %c0_2 = arith.constant 0 : index
    %c0_3 = arith.constant 0 : index
    %1 = vector.load %arg2[%c0_1, %c0_2, %c0_3] : memref<4x108x27xbf16, #tpu.memory_space<vmem>>, vector<1x108x27xbf16>
    %2 = vector.shape_cast %1 : vector<1x108x27xbf16> to vector<108x27xbf16>
    %c1 = arith.constant 1 : index
    %c0_4 = arith.constant 0 : index
    %c0_5 = arith.constant 0 : index
    %3 = vector.load %arg2[%c1, %c0_4, %c0_5] : memref<4x108x27xbf16, #tpu.memory_space<vmem>>, vector<1x108x27xbf16>
    %4 = vector.shape_cast %3 : vector<1x108x27xbf16> to vector<108x27xbf16>
    %5 = arith.truncf %0 : vector<2x108xf32> to vector<2x108xbf16>
    %6 = arith.extf %5 : vector<2x108xbf16> to vector<2x108xf32>
    %7 = arith.subf %0, %6 : vector<2x108xf32>
    %8 = arith.truncf %7 : vector<2x108xf32> to vector<2x108xbf16>
    %cst = arith.constant dense<0.000000e+00> : vector<2x27xf32>
    %9 = tpu.matmul %5, %2, %cst {dimension_numbers = #tpu.dot_dimension_numbers<[1], [0], [0], [1], [0, 0, 1, 1], [], []>} : vector<2x108xbf16>, vector<108x27xbf16>, vector<2x27xf32> -> vector<2x27xf32>
    %cst_6 = arith.constant dense<0.000000e+00> : vector<2x27xf32>
    %10 = tpu.matmul %8, %2, %cst_6 {dimension_numbers = #tpu.dot_dimension_numbers<[1], [0], [0], [1], [0, 0, 1, 1], [], []>} : vector<2x108xbf16>, vector<108x27xbf16>, vector<2x27xf32> -> vector<2x27xf32>
    %11 = arith.addf %9, %10 : vector<2x27xf32>
    %cst_7 = arith.constant dense<0.000000e+00> : vector<2x27xf32>
    %12 = tpu.matmul %5, %4, %cst_7 {dimension_numbers = #tpu.dot_dimension_numbers<[1], [0], [0], [1], [0, 0, 1, 1], [], []>} : vector<2x108xbf16>, vector<108x27xbf16>, vector<2x27xf32> -> vector<2x27xf32>
    %13 = arith.addf %11, %12 : vector<2x27xf32>
    %cst_8 = arith.constant dense<0.000000e+00> : vector<2x27xf32>
    %14 = tpu.matmul %8, %4, %cst_8 {dimension_numbers = #tpu.dot_dimension_numbers<[1], [0], [0], [1], [0, 0, 1, 1], [], []>} : vector<2x108xbf16>, vector<108x27xbf16>, vector<2x27xf32> -> vector<2x27xf32>
    %15 = arith.addf %13, %14 : vector<2x27xf32>
    %c0_9 = arith.constant 0 : index
    %c0_10 = arith.constant 0 : index
    %16 = vector.load %arg1[%c0_9, %c0_10] : memref<2x108xf32, #tpu.memory_space<vmem>>, vector<2x108xf32>
    %c2 = arith.constant 2 : index
    %c0_11 = arith.constant 0 : index
    %c0_12 = arith.constant 0 : index
    %17 = vector.load %arg2[%c2, %c0_11, %c0_12] : memref<4x108x27xbf16, #tpu.memory_space<vmem>>, vector<1x108x27xbf16>
    %18 = vector.shape_cast %17 : vector<1x108x27xbf16> to vector<108x27xbf16>
    %c3 = arith.constant 3 : index
    %c0_13 = arith.constant 0 : index
    %c0_14 = arith.constant 0 : index
    %19 = vector.load %arg2[%c3, %c0_13, %c0_14] : memref<4x108x27xbf16, #tpu.memory_space<vmem>>, vector<1x108x27xbf16>
    %20 = vector.shape_cast %19 : vector<1x108x27xbf16> to vector<108x27xbf16>
    %21 = arith.truncf %16 : vector<2x108xf32> to vector<2x108xbf16>
    %22 = arith.extf %21 : vector<2x108xbf16> to vector<2x108xf32>
    %23 = arith.subf %16, %22 : vector<2x108xf32>
    %24 = arith.truncf %23 : vector<2x108xf32> to vector<2x108xbf16>
    %cst_15 = arith.constant dense<0.000000e+00> : vector<2x27xf32>
    %25 = tpu.matmul %21, %18, %cst_15 {dimension_numbers = #tpu.dot_dimension_numbers<[1], [0], [0], [1], [0, 0, 1, 1], [], []>} : vector<2x108xbf16>, vector<108x27xbf16>, vector<2x27xf32> -> vector<2x27xf32>
    %cst_16 = arith.constant dense<0.000000e+00> : vector<2x27xf32>
    %26 = tpu.matmul %24, %18, %cst_16 {dimension_numbers = #tpu.dot_dimension_numbers<[1], [0], [0], [1], [0, 0, 1, 1], [], []>} : vector<2x108xbf16>, vector<108x27xbf16>, vector<2x27xf32> -> vector<2x27xf32>
    %27 = arith.addf %25, %26 : vector<2x27xf32>
    %cst_17 = arith.constant dense<0.000000e+00> : vector<2x27xf32>
    %28 = tpu.matmul %21, %20, %cst_17 {dimension_numbers = #tpu.dot_dimension_numbers<[1], [0], [0], [1], [0, 0, 1, 1], [], []>} : vector<2x108xbf16>, vector<108x27xbf16>, vector<2x27xf32> -> vector<2x27xf32>
    %29 = arith.addf %27, %28 : vector<2x27xf32>
    %cst_18 = arith.constant dense<0.000000e+00> : vector<2x27xf32>
    %30 = tpu.matmul %24, %20, %cst_18 {dimension_numbers = #tpu.dot_dimension_numbers<[1], [0], [0], [1], [0, 0, 1, 1], [], []>} : vector<2x108xbf16>, vector<108x27xbf16>, vector<2x27xf32> -> vector<2x27xf32>
    %31 = arith.addf %29, %30 : vector<2x27xf32>
    %32 = arith.addf %15, %31 : vector<2x27xf32>
    %c0_19 = arith.constant 0 : index
    %c0_20 = arith.constant 0 : index
    %33 = vector.load %arg3[%c0_19, %c0_20] : memref<1x27xf32, #tpu.memory_space<vmem>>, vector<1x27xf32>
    %34 = vector.broadcast %33 : vector<1x27xf32> to vector<2x27xf32>
    %35 = arith.addf %32, %34 : vector<2x27xf32>
    %c0_21 = arith.constant 0 : index
    %c0_22 = arith.constant 0 : index
    %36 = vector.load %arg4[%c0_21, %c0_22] : memref<2x27xf32, #tpu.memory_space<vmem>>, vector<2x27xf32>
    tpu.vector_store %arg4[%c0_21, %c0_22], %35 {strides = array<i32>} : memref<2x27xf32, #tpu.memory_space<vmem>>, vector<2x27xf32>,
    return
  }
}

</mosaic_0001>

<bundles_post_ra>
// kernel: model_forward.1
= control target key start
LH: loop header
LB: loop body
LE: loop exit
PB: predicated region body
PF: predicated region fallthrough
CT: control target
= control target key end

     0   :  { %vm97_vm0 = vcmask 1045504   ;;  %v933_v0 = vmov 0.0   ;;  %vm934_vm1 = vmmov 0   ;;  %vm93_vm2 = vcmask 883712   ;;  %s1149_s2 = inlined_call_operand.vmem [shape: bf16[4,108,27], index: 2, kind: input, shape index: {}]   ;;  %s1150_s0 = inlined_call_operand.vmem [shape: f32[2,108], index: 0, kind: input, shape index: {}]   ;;  %s1151_s1 = inlined_call_operand.vmem [shape: f32[2,108], index: 1, kind: input, shape index: {}]   ;;  %s1152_s3 = inlined_call_operand.vmem [shape: f32[1,27], index: 3, kind: input, shape index: {}]   ;;  %s1153_s4 = inlined_call_operand.vmem [shape: f32[2,27], index: 4, kind: output, shape index: {}]  }
   0x1   :  { %759 = vmatprep.subr.bf16.mxu0 %v933_v0  ;;  %777 = vmatprep.subr.bf16.mxu1 %v933_v0  ;;  %v905_v1 = vld [vmem:[%s1149_s2 + $0x30] sm:$0x3f]   ;;  %v906_v3 = vld [vmem:[%s1149_s2 + $0x28] sm:$0xff]   ;;  %v907_v4 = vld [vmem:[%s1149_s2 + $0x20] sm:$0xff]   ;;  %vm610_vm3 = vcmask 214016  }
   0x2   :  { %773 = vmatprep.mubr.msk.bf16.mxu0 %vm934_vm1, %v933_v0  ;;  %791 = vmatprep.mubr.msk.bf16.mxu1 %vm934_vm1, %v933_v0  ;;  %v99_v2 = vsel %vm97_vm0, %v905_v1, 0  ;;  %v908_v5 = vld [vmem:[%s1149_s2 + $0x18] sm:$0xff]   ;;  %v18_v6 = vld [vmem:[%s1150_s0] sm:$0x3]  ;;  %v909_v8 = vld [vmem:[%s1149_s2 + $0x10] sm:$0xff]  }
   0x3   :  { %760 = vmatpush3.bf16.msra.mxu0 %v99_v2  ;;  %778 = vmatpush3.bf16.msra.mxu1 %v99_v2  ;;  %v988_v7 = vpack.c.bf16 %v18_v6, %v18_v6  ;;  %v910_v10 = vld [vmem:[%s1149_s2 + $0x8] sm:$0xff]   ;;  %v911_v11 = vld [vmem:[%s1149_s2] sm:$0xff]   ;;  %v926_v13 = vld [vmem:[%s1149_s2 + $0xd8] sm:$0x3f]  }
   0x4   :  { %761 = vmatprep.subr.bf16.mxu0 %v933_v0  ;;  %779 = vmatprep.subr.bf16.mxu1 %v933_v0  ;;  %v912_v14 = vld [vmem:[%s1149_s2 + $0x68] sm:$0x3f]   ;;  %v1013_v15 = vsel %vm97_vm0, %v926_v13, 0  ;;  %v913_v18 = vld [vmem:[%s1149_s2 + $0x60] sm:$0xff]   ;;  %v914_v19 = vld [vmem:[%s1149_s2 + $0x58] sm:$0xff]  }
   0x5   :  { %v49_v9 = vunpack.c.l.bf16 %v988_v7  ;;  %v226_v17 = vsel %vm97_vm0, %v912_v14, 0  ;;  %v915_v20 = vld [vmem:[%s1149_s2 + $0x50] sm:$0xff]   ;;  %v916_v21 = vld [vmem:[%s1149_s2 + $0x48] sm:$0xff]   ;;  %v917_v22 = vld [vmem:[%s1149_s2 + $0x40] sm:$0xff]  }
   0x6   :  { %v918_v23 = vld [vmem:[%s1149_s2 + $0x38] sm:$0xff]   ;;  %v919_v24 = vld [vmem:[%s1149_s2 + $0xa0] sm:$0x3f]   ;;  %v921_v27 = vld [vmem:[%s1149_s2 + $0x90] sm:$0xff]  }
   0x7   :  { %762 = vmatpush3.bf16.msra.mxu0 %v906_v3  ;;  %780 = vmatpush3.bf16.msra.mxu1 %v906_v3  ;;  %v50_v12 = vsub.f32 %v18_v6, %v49_v9  ;;  %v390_v25 = vsel %vm97_vm0, %v919_v24, 0  ;;  %v920_v26 = vld [vmem:[%s1149_s2 + $0x98] sm:$0xff]   ;;  %v922_v28 = vld [vmem:[%s1149_s2 + $0x88] sm:$0xff]   ;;  %v310_v29 = vld [vmem:[%s1151_s1] sm:$0x3] }
   0x8   :  { %763 = vmatprep.subr.bf16.mxu0 %v933_v0  ;;  %781 = vmatprep.subr.bf16.mxu1 %v933_v0  ;;  %v341_v30 = vpack.c.bf16 %v310_v29, %v310_v29  ;;  %v923_v31 = vld [vmem:[%s1149_s2 + $0x80] sm:$0xff]   ;;  %v924_v33 = vld [vmem:[%s1149_s2 + $0x78] sm:$0xff]   ;;  %v925_v35 = vld [vmem:[%s1149_s2 + $0x70] sm:$0xff]  }
   0x9   :  { %v51_v16 = vpack.c.bf16 %v50_v12, %v50_v12  ;;  %v927_v37 = vld [vmem:[%s1149_s2 + $0xd0] sm:$0xff]   ;;  %v928_v38 = vld [vmem:[%s1149_s2 + $0xc8] sm:$0xff]   ;;  %v929_v39 = vld [vmem:[%s1149_s2 + $0xc0] sm:$0xff]  }
   0xa   :  { %v342_v32 = vunpack.c.l.bf16 %v341_v30  ;;  %v930_v40 = vld [vmem:[%s1149_s2 + $0xb8] sm:$0xff]   ;;  %v931_v41 = vld [vmem:[%s1149_s2 + $0xb0] sm:$0xff]   ;;  %v932_v42 = vld [vmem:[%s1149_s2 + $0xa8] sm:$0xff]  }
   0xb   :  { %764 = vmatpush3.bf16.msra.mxu0 %v907_v4  ;;  %782 = vmatpush3.bf16.msra.mxu1 %v907_v4  ;;  %v694_v13 = vld [vmem:[%s1152_s3] ss:$0 sm:$0xff] }
   0xc   :  { %765 = vmatprep.subr.bf16.mxu0 %v933_v0  ;;  %783 = vmatprep.subr.bf16.mxu1 %v933_v0  ;;  %v343_v34 = vsub.f32 %v310_v29, %v342_v32 }
   0xe   :  { %v344_v36 = vpack.c.bf16 %v343_v34, %v343_v34 }
   0xf   :  { %766 = vmatpush3.bf16.msra.mxu0 %v908_v5  ;;  %784 = vmatpush3.bf16.msra.mxu1 %v908_v5 }
  0x10   :  { %767 = vmatprep.subr.bf16.mxu0 %v933_v0  ;;  %785 = vmatprep.subr.bf16.mxu1 %v933_v0 }
  0x13   :  { %768 = vmatpush3.bf16.msra.mxu0 %v909_v8  ;;  %786 = vmatpush3.bf16.msra.mxu1 %v909_v8 }
  0x14   :  { %769 = vmatprep.subr.bf16.mxu0 %v933_v0  ;;  %787 = vmatprep.subr.bf16.mxu1 %v933_v0 }
  0x17   :  { %770 = vmatpush3.bf16.msra.mxu0 %v910_v10  ;;  %788 = vmatpush3.bf16.msra.mxu1 %v910_v10 }
  0x18   :  { %771 = vmatprep.subr.bf16.mxu0 %v933_v0  ;;  %789 = vmatprep.subr.bf16.mxu1 %v933_v0 }
  0x1b   :  { %772 = vmatpush3.bf16.msra.mxu0 %v911_v11  ;;  %790 = vmatpush3.bf16.msra.mxu1 %v911_v11 }
  0x1c   :  { %795 = vmatprep.subr.bf16.mxu0 %v933_v0  ;;  %813 = vmatprep.subr.bf16.mxu1 %v933_v0 }
  0x1e   :  { %774 = vmatmul.mubr.msk.bf16.vlgmr.msra.gmra.mxu0 %vm93_vm2, %v51_v16  ;;  %792 = vmatmul.mubr.msk.bf16.vlgmr.msra.gmra.mxu1 %vm93_vm2, %v988_v7 }
  0x1f   :  { %796 = vmatpush3.bf16.msra.mxu0 %v226_v17  ;;  %814 = vmatpush3.bf16.msra.mxu1 %v226_v17 }
  0x20   :  { %797 = vmatprep.subr.bf16.mxu0 %v933_v0  ;;  %815 = vmatprep.subr.bf16.mxu1 %v933_v0 }
  0x21   :  { %809 = vmatprep.mubr.msk.bf16.mxu0 %vm934_vm1, %v933_v0  ;;  %827 = vmatprep.mubr.msk.bf16.mxu1 %vm934_vm1, %v933_v0 }
  0x23   :  { %798 = vmatpush3.bf16.msra.mxu0 %v913_v18  ;;  %816 = vmatpush3.bf16.msra.mxu1 %v913_v18 }
  0x24   :  { %799 = vmatprep.subr.bf16.mxu0 %v933_v0  ;;  %817 = vmatprep.subr.bf16.mxu1 %v933_v0 }
  0x27   :  { %800 = vmatpush3.bf16.msra.mxu0 %v914_v19  ;;  %818 = vmatpush3.bf16.msra.mxu1 %v914_v19 }
  0x28   :  { %801 = vmatprep.subr.bf16.mxu0 %v933_v0  ;;  %819 = vmatprep.subr.bf16.mxu1 %v933_v0 }
  0x2b   :  { %802 = vmatpush3.bf16.msra.mxu0 %v915_v20  ;;  %820 = vmatpush3.bf16.msra.mxu1 %v915_v20 }
  0x2c   :  { %803 = vmatprep.subr.bf16.mxu0 %v933_v0  ;;  %821 = vmatprep.subr.bf16.mxu1 %v933_v0 }
  0x2f   :  { %804 = vmatpush3.bf16.msra.mxu0 %v916_v21  ;;  %822 = vmatpush3.bf16.msra.mxu1 %v916_v21 }
  0x30   :  { %805 = vmatprep.subr.bf16.mxu0 %v933_v0  ;;  %823 = vmatprep.subr.bf16.mxu1 %v933_v0 }
  0x33   :  { %806 = vmatpush3.bf16.msra.mxu0 %v917_v22  ;;  %824 = vmatpush3.bf16.msra.mxu1 %v917_v22 }
  0x34   :  { %807 = vmatprep.subr.bf16.mxu0 %v933_v0  ;;  %825 = vmatprep.subr.bf16.mxu1 %v933_v0 }
  0x37   :  { %808 = vmatpush3.bf16.msra.mxu0 %v918_v23  ;;  %826 = vmatpush3.bf16.msra.mxu1 %v918_v23 }
  0x38   :  { %831 = vmatprep.subr.bf16.mxu0 %v933_v0  ;;  %849 = vmatprep.subr.bf16.mxu1 %v933_v0 }
  0x3a   :  { %810 = vmatmul.mubr.msk.bf16.vlgmr.msra.gmra.mxu0 %vm93_vm2, %v988_v7  ;;  %828 = vmatmul.mubr.msk.bf16.vlgmr.msra.gmra.mxu1 %vm93_vm2, %v51_v16 }
  0x3b   :  { %832 = vmatpush3.bf16.msra.mxu0 %v390_v25  ;;  %850 = vmatpush3.bf16.msra.mxu1 %v390_v25 }
  0x3c   :  { %833 = vmatprep.subr.bf16.mxu0 %v933_v0  ;;  %851 = vmatprep.subr.bf16.mxu1 %v933_v0 }
  0x3d   :  { %845 = vmatprep.mubr.msk.bf16.mxu0 %vm934_vm1, %v933_v0  ;;  %863 = vmatprep.mubr.msk.bf16.mxu1 %vm934_vm1, %v933_v0 }
  0x3f   :  { %834 = vmatpush3.bf16.msra.mxu0 %v920_v26  ;;  %852 = vmatpush3.bf16.msra.mxu1 %v920_v26 }
  0x40   :  { %835 = vmatprep.subr.bf16.mxu0 %v933_v0  ;;  %853 = vmatprep.subr.bf16.mxu1 %v933_v0 }
  0x43   :  { %836 = vmatpush3.bf16.msra.mxu0 %v921_v27  ;;  %854 = vmatpush3.bf16.msra.mxu1 %v921_v27 }
  0x44   :  { %837 = vmatprep.subr.bf16.mxu0 %v933_v0  ;;  %855 = vmatprep.subr.bf16.mxu1 %v933_v0 }
  0x47   :  { %838 = vmatpush3.bf16.msra.mxu0 %v922_v28  ;;  %856 = vmatpush3.bf16.msra.mxu1 %v922_v28 }
  0x48   :  { %839 = vmatprep.subr.bf16.mxu0 %v933_v0  ;;  %857 = vmatprep.subr.bf16.mxu1 %v933_v0 }
  0x4b   :  { %840 = vmatpush3.bf16.msra.mxu0 %v923_v31  ;;  %858 = vmatpush3.bf16.msra.mxu1 %v923_v31 }
  0x4c   :  { %841 = vmatprep.subr.bf16.mxu0 %v933_v0  ;;  %859 = vmatprep.subr.bf16.mxu1 %v933_v0 }
  0x4f   :  { %842 = vmatpush3.bf16.msra.mxu0 %v924_v33  ;;  %860 = vmatpush3.bf16.msra.mxu1 %v924_v33 }
  0x50   :  { %843 = vmatprep.subr.bf16.mxu0 %v933_v0  ;;  %861 = vmatprep.subr.bf16.mxu1 %v933_v0 }
  0x53   :  { %844 = vmatpush3.bf16.msra.mxu0 %v925_v35  ;;  %862 = vmatpush3.bf16.msra.mxu1 %v925_v35 }
  0x54   :  { %867 = vmatprep.subr.bf16.mxu0 %v933_v0  ;;  %885 = vmatprep.subr.bf16.mxu1 %v933_v0 }
  0x56   :  { %846 = vmatmul.mubr.msk.bf16.vlgmr.msra.gmra.mxu0 %vm93_vm2, %v344_v36  ;;  %864 = vmatmul.mubr.msk.bf16.vlgmr.msra.gmra.mxu1 %vm93_vm2, %v341_v30 }
  0x57   :  { %868 = vmatpush3.bf16.msra.mxu0 %v1013_v15  ;;  %886 = vmatpush3.bf16.msra.mxu1 %v1013_v15 }
  0x58   :  { %869 = vmatprep.subr.bf16.mxu0 %v933_v0  ;;  %887 = vmatprep.subr.bf16.mxu1 %v933_v0 }
  0x59   :  { %881 = vmatprep.mubr.msk.bf16.mxu0 %vm934_vm1, %v933_v0  ;;  %899 = vmatprep.mubr.msk.bf16.mxu1 %vm934_vm1, %v933_v0 }
  0x5b   :  { %870 = vmatpush3.bf16.msra.mxu0 %v927_v37  ;;  %888 = vmatpush3.bf16.msra.mxu1 %v927_v37 }
  0x5c   :  { %871 = vmatprep.subr.bf16.mxu0 %v933_v0  ;;  %889 = vmatprep.subr.bf16.mxu1 %v933_v0 }
  0x5f   :  { %872 = vmatpush3.bf16.msra.mxu0 %v928_v38  ;;  %890 = vmatpush3.bf16.msra.mxu1 %v928_v38 }
  0x60   :  { %873 = vmatprep.subr.bf16.mxu0 %v933_v0  ;;  %891 = vmatprep.subr.bf16.mxu1 %v933_v0 }
  0x63   :  { %874 = vmatpush3.bf16.msra.mxu0 %v929_v39  ;;  %892 = vmatpush3.bf16.msra.mxu1 %v929_v39 }
  0x64   :  { %875 = vmatprep.subr.bf16.mxu0 %v933_v0  ;;  %893 = vmatprep.subr.bf16.mxu1 %v933_v0 }
  0x67   :  { %876 = vmatpush3.bf16.msra.mxu0 %v930_v40  ;;  %894 = vmatpush3.bf16.msra.mxu1 %v930_v40 }
  0x68   :  { %877 = vmatprep.subr.bf16.mxu0 %v933_v0  ;;  %895 = vmatprep.subr.bf16.mxu1 %v933_v0 }
  0x6b   :  { %878 = vmatpush3.bf16.msra.mxu0 %v931_v41  ;;  %896 = vmatpush3.bf16.msra.mxu1 %v931_v41 }
  0x6c   :  { %879 = vmatprep.subr.bf16.mxu0 %v933_v0  ;;  %897 = vmatprep.subr.bf16.mxu1 %v933_v0 }
  0x6f   :  { %880 = vmatpush3.bf16.msra.mxu0 %v932_v42  ;;  %898 = vmatpush3.bf16.msra.mxu1 %v932_v42 }
  0x72   :  { %882 = vmatmul.mubr.msk.bf16.vlgmr.msra.gmra.mxu0 %vm93_vm2, %v341_v30  ;;  %900 = vmatmul.mubr.msk.bf16.vlgmr.msra.gmra.mxu1 %vm93_vm2, %v344_v36 }
  0xde   :  { %v135_v43 = vpop.f32.mrf.mxu0  ;;  %v178_v44 = vpop.f32.mrf.mxu1 }
  0xdf   :  { %v179_v45 = vadd.f32 %v178_v44, %v135_v43 }
  0xe0   :  { %v775_v46 = vpop.f32.mrf.mxu0  ;;  %v793_v47 = vpop.f32.mrf.mxu1 }
  0xe2   :  { %v138_v48 = vpop.f32.mrf.mxu0  ;;  %v181_v49 = vpop.f32.mrf.mxu1 }
  0xe4   :  { %v776_v50 = vpop.f32.mrf.mxu0  ;;  %v794_v51 = vpop.f32.mrf.mxu1 }
  0xfa   :  { %v262_v52 = vpop.f32.mrf.mxu0  ;;  %v303_v53 = vpop.f32.mrf.mxu1 }
  0xfb   :  { %v268_v4 = vadd.f32 %v262_v52, %v179_v45 }
  0xfc   :  { %v811_v54 = vpop.f32.mrf.mxu0  ;;  %v829_v55 = vpop.f32.mrf.mxu1 }
  0xfd   :  { %v309_v11 = vadd.f32 %v303_v53, %v268_v4 }
  0xfe   :  { %v265_v56 = vpop.f32.mrf.mxu0  ;;  %v306_v57 = vpop.f32.mrf.mxu1 }
 0x100   :  { %v812_v58 = vpop.f32.mrf.mxu0  ;;  %v830_v59 = vpop.f32.mrf.mxu1 }
 0x116   :  { %v426_v60 = vpop.f32.mrf.mxu0  ;;  %v469_v61 = vpop.f32.mrf.mxu1 }
 0x117   :  { %v470_v5 = vadd.f32 %v469_v61, %v426_v60 }
 0x118   :  { %v847_v62 = vpop.f32.mrf.mxu0  ;;  %v865_v63 = vpop.f32.mrf.mxu1 }
 0x11a   :  { %v429_v0 = vpop.f32.mrf.mxu0  ;;  %v472_v1 = vpop.f32.mrf.mxu1 }
 0x11c   :  { %v848_v2 = vpop.f32.mrf.mxu0  ;;  %v866_v3 = vpop.f32.mrf.mxu1 }
 0x132   :  { %v553_v6 = vpop.f32.mrf.mxu0  ;;  %v594_v7 = vpop.f32.mrf.mxu1 }
 0x133   :  { %v559_v8 = vadd.f32 %v553_v6, %v470_v5 }
 0x134   :  { %v883_v9 = vpop.f32.mrf.mxu0  ;;  %v901_v10 = vpop.f32.mrf.mxu1 }
 0x135   :  { %v600_v12 = vadd.f32 %v594_v7, %v559_v8 }
 0x136   :  { %v556_v14 = vpop.f32.mrf.mxu0  ;;  %v597_v15 = vpop.f32.mrf.mxu1 }
 0x137   :  { %v601_v16 = vadd.f32 %v600_v12, %v309_v11 }
 0x138   :  { %v884_v17 = vpop.f32.mrf.mxu0  ;;  %v902_v18 = vpop.f32.mrf.mxu1 }
 0x139   :  { %v609_v19 = vadd.f32 %v694_v13, %v601_v16 }
 0x13b   :  { %611 = vst.msk [vmem:[%s1153_s4] sm:$0x3] %vm610_vm3, %v609_v19 }

</bundles_post_ra>
